<compile_context>
chip_gen: v7x
topology: tpu7x:2x2x1
jax: 0.10.0
libtpu: 0.0.40
codegen_flags: <defaults>
</compile_context>

<pallas_src>
import math

import jax
import jax.numpy as jnp
from jax.experimental import pallas as pl
from jax.experimental.pallas import tpu as pltpu


_MIB = 1024 * 1024


def _cdiv(a, b):
    return -(-a // b)


def _round_up(v, m):
    return _cdiv(v, m) * m


def _sublane_mult(itemsize):
    # f32 -> 8 sublanes per vreg, bf16 -> 16, int8/fp8 -> 32 (packing rule).
    return max(8, 32 // max(itemsize, 1))


def _padded_bytes_2d(rows, w, itemsize):
    sub = _sublane_mult(itemsize)
    return _round_up(rows, sub) * _round_up(w, 128) * itemsize


def _padded_bytes_3d(tile_r, n, tile_c, itemsize):
    sub = _sublane_mult(itemsize)
    return tile_r * _round_up(n, sub) * _round_up(tile_c, 128) * itemsize


def _hw_params():
    """(target_block_bytes, vmem_limit_bytes, min_grid_steps) for this chip."""
    try:
        cap = int(pltpu.get_tpu_info().vmem_capacity_bytes)
    except Exception:
        cap = 64 * _MIB  # conservative default: v7x per-TensorCore VMEM
    if cap <= 64 * _MIB:
        # v7x: 64 MiB/TC, 2 TensorCores/chip, ~3.2 TB/s HBM.  Larger blocks hide the
        # ~0.35us per-step overhead; >= 2 steps per core keeps both cores pipelined.
        # (Alternative: keep 8 MiB blocks + pipeline_mode=pl.Buffered(3).)
        target = 14 * _MIB
        vmem_limit = min((cap * 3) // 4, 48 * _MIB)
        min_steps = 4
    else:
        # v5e/v6e: 128 MiB/TC, single TensorCore -> no forced step splitting.
        target = 24 * _MIB
        vmem_limit = min((cap * 3) // 4, 96 * _MIB)
        min_steps = 1
    return target, vmem_limit, min_steps


# ---------------------------------------------------------------------------
# Kernel 1: reduction axis is the minor (lane) axis.  Block (rows, W) -> (rows, 1).
# ---------------------------------------------------------------------------
def _var_minor_kernel(x_ref, o_ref):
    x = x_ref[...].astype(jnp.float32)
    w = x.shape[-1]
    mean = jnp.sum(x, axis=-1, keepdims=True) * (1.0 / w)
    d = x - mean
    var = jnp.sum(d * d, axis=-1, keepdims=True) * (1.0 / (w - 1))
    o_ref[...] = var.astype(o_ref.dtype)


def _choose_rows(m, w, itemsize, target, min_steps):
    sub = _sublane_mult(itemsize)
    row_bytes = _round_up(w, 128) * itemsize  # padded bytes for one row of the block
    fit = max(sub, (target // max(row_bytes, 1)) // sub * sub)
    # TODO(synk): for extremely long reduce axes (round_up(w,128)*itemsize*sub > target)
    # add a reduction grid axis over W with running (count, mean, M2) scratch combine.
    rows = m if fit >= m else fit
    # Keep >= min_steps grid steps when there is enough work (v7x: >= 2 per core).
    while rows > sub and _cdiv(m, rows) < min_steps:
        rows = max(sub, (rows // 2) // sub * sub)
    # rows is either == m (full dim) or a multiple of `sub` -> legal block shape.
    return rows


def _var_minor(x2d, out_dtype):
    m, w = x2d.shape
    itemsize = jnp.dtype(x2d.dtype).itemsize
    target, vmem_limit, min_steps = _hw_params()
    rows = _choose_rows(m, w, itemsize, target, min_steps)
    grid = (_cdiv(m, rows),)
    # TODO(synk): for very small W (< ~64-128) on v5e, accumulate into an (8,128)
    # lane-dense VMEM scratch and flush via an XLU relayout to avoid masked
    # single-lane stores; FBMSNet's temporal W (>= ~100) is read-bandwidth bound so
    # the (rows, 1) output block is already hidden under the HBM reads.
    out = pl.pallas_call(
        _var_minor_kernel,
        out_shape=jax.ShapeDtypeStruct((m, 1), out_dtype),
        grid_spec=pltpu.PrefetchScalarGridSpec(
            num_scalar_prefetch=0,
            grid=grid,
            in_specs=[pl.BlockSpec((rows, w), lambda i: (i, 0))],
            out_specs=pl.BlockSpec((rows, 1), lambda i: (i, 0)),
        ),
        compiler_params=pltpu.CompilerParams(
            dimension_semantics=("parallel",),
            vmem_limit_bytes=vmem_limit,
        ),
    )(x2d)
    return out  # (m, 1)


# ---------------------------------------------------------------------------
# Kernel 2: reduction axis is NOT minor.  Block (tile_r, N, tile_c), reduce the
# sublane axis; output block (tile_r, 1, tile_c) is lane-dense.
# ---------------------------------------------------------------------------
def _var_mid_kernel(x_ref, o_ref):
    x = x_ref[...].astype(jnp.float32)
    n = x.shape[1]
    mean = jnp.sum(x, axis=1, keepdims=True) * (1.0 / n)
    d = x - mean
    var = jnp.sum(d * d, axis=1, keepdims=True) * (1.0 / (n - 1))
    o_ref[...] = var.astype(o_ref.dtype)


def _choose_3d_tiles(r, n, c, itemsize, target, min_steps):
    # Lanes: full C when small; otherwise a balanced multiple-of-128 tile near 512
    # (avoids pathological 512 + tiny-edge splits).
    if c <= 512:
        tile_c = c
    else:
        tile_c = _round_up(_cdiv(c, _cdiv(c, 512)), 128)
    # Shrink lanes toward 128 before pinning tile_r == 1 when one column block is big.
    while tile_c > 128 and _padded_bytes_3d(1, n, tile_c, itemsize) > target:
        tile_c = max(128, (tile_c // 2) // 128 * 128)
    col_bytes = _padded_bytes_3d(1, n, tile_c, itemsize)
    tile_r = max(1, min(r, target // max(col_bytes, 1)))
    # TODO(synk): if even (1, n, 128) exceeds the budget (huge N), add a reduction
    # grid axis over N with running (count, mean, M2) scratch + pl.when init/finalize.
    # Keep >= min_steps total grid steps when possible (v7x: >= 2 per TensorCore).
    while tile_r > 1 and _cdiv(r, tile_r) * _cdiv(c, tile_c) < min_steps:
        tile_r = max(1, tile_r // 2)
    return tile_r, tile_c


def _var_mid(x3d, out_dtype):
    r, n, c = x3d.shape
    itemsize = jnp.dtype(x3d.dtype).itemsize
    target, vmem_limit, min_steps = _hw_params()
    tile_r, tile_c = _choose_3d_tiles(r, n, c, itemsize, target, min_steps)
    grid = (_cdiv(r, tile_r), _cdiv(c, tile_c))
    out = pl.pallas_call(
        _var_mid_kernel,
        out_shape=jax.ShapeDtypeStruct((r, 1, c), out_dtype),
        grid_spec=pltpu.PrefetchScalarGridSpec(
            num_scalar_prefetch=0,
            grid=grid,
            in_specs=[pl.BlockSpec((tile_r, n, tile_c), lambda i, j: (i, 0, j))],
            out_specs=pl.BlockSpec((tile_r, 1, tile_c), lambda i, j: (i, 0, j)),
        ),
        compiler_params=pltpu.CompilerParams(
            dimension_semantics=("parallel", "parallel"),
            vmem_limit_bytes=vmem_limit,
        ),
    )(x3d)
    return out  # (r, 1, c)


# ---------------------------------------------------------------------------
# Public wrapper: Pallas equivalent of VarLayer.forward
# ---------------------------------------------------------------------------
def var_layer(x, dim):
    ndim = x.ndim
    dim = dim % ndim
    shape = x.shape
    out_shape = shape[:dim] + (1,) + shape[dim + 1:]
    n = shape[dim]
    if n <= 1:
        # torch.var(unbiased=True) over a length-1 axis is 0/0 -> NaN.
        return jnp.full(out_shape, jnp.nan, dtype=x.dtype)

    lead = math.prod(shape[:dim]) if dim > 0 else 1
    trail = math.prod(shape[dim + 1:]) if dim < ndim - 1 else 1

    if trail == 1:
        # Reducing the minor axis: contiguous (free) reshape to (lead, n).
        v = _var_minor(x.reshape(lead, n), x.dtype)          # (lead, 1)
    else:
        # Reducing a non-minor axis: contiguous reshape to (lead, n, trail);
        # no XLA transpose, the original minor axis stays on lanes.
        v = _var_mid(x.reshape(lead, n, trail), x.dtype)     # (lead, 1, trail)
    return v.reshape(out_shape)


if __name__ == "__main__":
    key = jax.random.PRNGKey(0)
    # Small NCHW input consistent with FBMSNet usage (batch, ch, electrodes, time).
    x = jax.random.normal(key, (2, 4, 16, 16), dtype=jnp.float32)

    # Primary FBMSNet usage: variance over the temporal (last) axis.
    out3 = jax.block_until_ready(var_layer(x, dim=3))
    ref3 = jnp.var(x, axis=3, keepdims=True, ddof=1)
    assert out3.shape == (2, 4, 16, 1), out3.shape
    assert jnp.allclose(out3, ref3, atol=1e-5, rtol=1e-5), "dim=3 mismatch vs reference"

    # Also exercise the transpose-free non-minor-axis path.
    out2 = jax.block_until_ready(var_layer(x, dim=2))
    ref2 = jnp.var(x, axis=2, keepdims=True, ddof=1)
    assert out2.shape == (2, 4, 1, 16), out2.shape
    assert jnp.allclose(out2, ref2, atol=1e-5, rtol=1e-5), "dim=2 mismatch vs reference"

    print("KERNEL_OK")
</pallas_src>

<mosaic_0001>
module attributes {stable_mosaic.version = 11 : i64} {
  func.func @_var_minor_kernel(%arg0: i32, %arg1: memref<32x16xf32, #tpu.memory_space<vmem>>, %arg2: memref<32x1xf32, #tpu.memory_space<vmem>>) attributes {dimension_semantics = [#tpu.dimension_semantics<parallel>], iteration_bounds = array<i64: 4>, scalar_prefetch = 0 : i64, scratch_operands = 0 : i64, tpu.core_type = #tpu.core_type<tc>, window_params = [{transform_indices = @transform_0, window_bounds = array<i64: 32, 16>}, {transform_indices = @transform_1, window_bounds = array<i64: 32, 1>}]} {
    %c0 = arith.constant 0 : index
    %c0_0 = arith.constant 0 : index
    %0 = vector.load %arg1[%c0, %c0_0] : memref<32x16xf32, #tpu.memory_space<vmem>>, vector<32x16xf32>
    %cst = arith.constant dense<0.000000e+00> : vector<32xf32>
    %1 = vector.multi_reduction <add>, %0, %cst [1] : vector<32x16xf32> to vector<32xf32>
    %2 = vector.shape_cast %1 : vector<32xf32> to vector<32x1xf32>
    %cst_1 = arith.constant 6.250000e-02 : f32
    %3 = vector.broadcast %cst_1 : f32 to vector<32x1xf32>
    %4 = arith.mulf %2, %3 : vector<32x1xf32>
    %5 = vector.broadcast %4 : vector<32x1xf32> to vector<32x16xf32>
    %6 = arith.subf %0, %5 : vector<32x16xf32>
    %7 = arith.mulf %6, %6 : vector<32x16xf32>
    %cst_2 = arith.constant dense<0.000000e+00> : vector<32xf32>
    %8 = vector.multi_reduction <add>, %7, %cst_2 [1] : vector<32x16xf32> to vector<32xf32>
    %9 = vector.shape_cast %8 : vector<32xf32> to vector<32x1xf32>
    %cst_3 = arith.constant 0.0666666701 : f32
    %10 = vector.broadcast %cst_3 : f32 to vector<32x1xf32>
    %11 = arith.mulf %9, %10 : vector<32x1xf32>
    %c0_4 = arith.constant 0 : index
    %c0_5 = arith.constant 0 : index
    %12 = vector.load %arg2[%c0_4, %c0_5] : memref<32x1xf32, #tpu.memory_space<vmem>>, vector<32x1xf32>
    tpu.vector_store %arg2[%c0_4, %c0_5], %11 {strides = array<i32>} : memref<32x1xf32, #tpu.memory_space<vmem>>, vector<32x1xf32>,
    return
  }
  func.func @transform_0(%arg0: i32) -> (i32, i32) {
    %c0_i32 = arith.constant 0 : i32
    %c0_i32_0 = arith.constant 0 : i32
    return %arg0, %c0_i32 : i32, i32
  }
  func.func @transform_1(%arg0: i32) -> (i32, i32) {
    %c0_i32 = arith.constant 0 : i32
    %c0_i32_0 = arith.constant 0 : i32
    return %arg0, %c0_i32 : i32, i32
  }
}

</mosaic_0001>

<bundles_post_ra>
// kernel: tpu_custom_call.1
= control target key start
LH: loop header
LB: loop body
LE: loop exit
PB: predicated region body
PF: predicated region fallthrough
CT: control target
= control target key end

     0   :  { %s263_s6 = smov 0   ;;  %s295_s0 = inlined_call_operand.vmem [shape: f32[128,16], index: 0, kind: input, shape index: {}]   ;;  %s296_s1 = inlined_call_operand.vmem [shape: f32[128,1], index: 1, kind: output, shape index: {}]  }
   0x1 LB: > { %s226_s7 = sadd.s32 4294967295, %s251_s6   ;;  %p230_p0 = scmp.ge.s32.totalorder %s251_s6, 1  ;;  %s251_s6 = sphi %s263_s6, %s11_s6  }
   0x2   : > { %p88_p1 = scmp.lt.s32.totalorder %s251_s6, 5 }
   0x4   : > { %p89_p2 = pnand %p230_p0, %p88_p1 }
   0x5   : > { %s231_s8 = sshll.u32 (!%p89_p2), %s226_s7, 2  ;;  %vm124_vm0 = vcmask (!%p89_p2), 130048   ;;  %vm165_vm1 = vcmask (!%p89_p2), 7168  }
   0x6   : > { %92 = sbr.rel (%p89_p2) target bundleno = 320 (0x140), region = 24  ;;  %p109_p3 = scmp.lt.s32.totalorder (!%p89_p2), %s231_s8, 15 }
   0xd   : > { %s298_s8 = smov (!%p109_p3, %s231_s8), 15 }
   0xe   : > { %s232_s9 = sshll.u32 %s298_s8, 3 }
   0xf   : > { %s112_s12 = scalar_lea.vmem %s295_s0, %s232_s9  ;;  %s118_s15 = scalar_lea.vmem %s296_s1, %s232_s9 }
  0x10   : > { %v120_v0 = vld [vmem:[%s112_s12] sm:$0xff]  ;;  %v122_v1 = vld [vmem:[%s112_s12 + $0x10] sm:$0xff]  ;;  %v121_v2 = vld [vmem:[%s112_s12 + $0x8] sm:$0xff] }
  0x11   : > { %v125_v3 = vsel %vm124_vm0, %v120_v0, 0.0  ;;  %v131_v4 = vsel %vm124_vm0, %v122_v1, 0.0  ;;  %v123_v5 = vld [vmem:[%s112_s12 + $0x18] sm:$0xff]  ;;  %v128_v6 = vsel %vm124_vm0, %v121_v2, 0.0 }
  0x12   : > { %126 = vadd.xlane.f32.xlu0 %v125_v3  ;;  %132 = vadd.xlane.f32.xlu1 %v131_v4  ;;  %v134_v7 = vsel %vm124_vm0, %v123_v5, 0.0 }
  0x16   : > { %129 = vadd.xlane.f32.xlu0 %v128_v6  ;;  %135 = vadd.xlane.f32.xlu1 %v134_v7 }
  0x9f   : > { %v127_v8 = vpop.xlane.xlu0 %126  ;;  %v133_v9 = vpop.xlane.xlu1 %132 }
  0xa0   : > { %v137_v10 = vmul.f32 0.0625, %v127_v8  ;;  %v139_v11 = vmul.f32 0.0625, %v133_v9 }
  0xa2   : > { %v141_v12 = vsub.f32 %v120_v0, %v137_v10  ;;  %v143_v13 = vsub.f32 %v122_v1, %v139_v11 }
  0xa3   : > { %v130_v14 = vpop.xlane.xlu0 %129  ;;  %v136_v15 = vpop.xlane.xlu1 %135 }
  0xa4   : > { %v138_v16 = vmul.f32 0.0625, %v130_v14  ;;  %v140_v17 = vmul.f32 0.0625, %v136_v15  ;;  %v145_v18 = vmul.f32 %v141_v12, %v141_v12  ;;  %v147_v19 = vmul.f32 %v143_v13, %v143_v13 }
  0xa6   : > { %v142_v20 = vsub.f32 %v121_v2, %v138_v16  ;;  %v144_v21 = vsub.f32 %v123_v5, %v140_v17  ;;  %v149_v22 = vsel %vm124_vm0, %v145_v18, 0.0  ;;  %v155_v23 = vsel %vm124_vm0, %v147_v19, 0.0 }
  0xa7   : > { %150 = vadd.xlane.f32.xlu0 %v149_v22 }
  0xa8   : > { %v146_v24 = vmul.f32 %v142_v20, %v142_v20  ;;  %v148_v25 = vmul.f32 %v144_v21, %v144_v21 }
  0xaa   : > { %v152_v26 = vsel %vm124_vm0, %v146_v24, 0.0  ;;  %v158_v27 = vsel %vm124_vm0, %v148_v25, 0.0 }
  0xab   : > { %156 = vadd.xlane.f32.xlu0 %v155_v23  ;;  %153 = vadd.xlane.f32.xlu1 %v152_v26 }
  0xaf   : > { %159 = vadd.xlane.f32.xlu1 %v158_v27 }
 0x134   : > { %v151_v28 = vpop.xlane.xlu0 %150 }
 0x135   : > { %v161_v29 = vmul.f32 0.06666667, %v151_v28 }
 0x137   : > { %166 = vst.msk [vmem:[%s118_s15] sm:$0xff] %vm165_vm1, %v161_v29 }
 0x138   : > { %v154_v30 = vpop.xlane.xlu1 %153  ;;  %v157_v31 = vpop.xlane.xlu0 %156 }
 0x139   : > { %v162_v32 = vmul.f32 0.06666667, %v154_v30  ;;  %v163_v33 = vmul.f32 0.06666667, %v157_v31 }
 0x13b   : > { %167 = vst.msk [vmem:[%s118_s15 + $0x8] sm:$0xff] %vm165_vm1, %v162_v32  ;;  %168 = vst.msk [vmem:[%s118_s15 + $0x10] sm:$0xff] %vm165_vm1, %v163_v33 }
 0x13c   : > { %v160_v34 = vpop.xlane.xlu1 %159 }
 0x13d   : > { %v164_v35 = vmul.f32 0.06666667, %v160_v34 }
 0x13f   : > { %169 = vst.msk [vmem:[%s118_s15 + $0x18] sm:$0xff] %vm165_vm1, %v164_v35 }
 0x140 PF: > { %s11_s6 = sadd.s32 1, %s251_s6  }
 0x141   : > { %p8_p4 = scmp.ge.s32.totalorder %s11_s6, 6  }
 0x143   :  { %10 = sbr.rel (!%p8_p4) target bundleno = 1 (0x1), region = 54 }

</bundles_post_ra>
